<compile_context>
chip_gen: v7x
topology: tpu7x:2x2x1
jax: 0.10.0
libtpu: 0.0.40
codegen_flags: <defaults>
</compile_context>

<pallas_src>
import functools

import jax
import jax.numpy as jnp
import numpy as np
from jax.experimental import pallas as pl
from jax.experimental.pallas import tpu as pltpu


def _bin_indicators(a_ref, mb_ref, ivl_ref, epsilon):
    """Boundary construction + 4-threshold binning (pure VALU work)."""
    a = a_ref[...]                                      # (TB, TN) f32
    # get_boundary_values folded in-kernel (per N-tile, once per grid step).
    lens = jnp.maximum(ivl_ref[...], 0.0) + epsilon     # (3, TN)
    b0 = mb_ref[...]                                    # (1, TN)
    b1 = b0 + lens[0:1, :]
    b2 = b1 + lens[1:2, :]
    b3 = b2 + lens[2:3, :]

    gt0 = a > b0
    gt1 = a > b1
    gt2 = a > b2
    gt3 = a > b3
    lt0 = a < b0
    lt1 = a < b1
    lt2 = a < b2
    lt3 = a < b3

    f32 = jnp.float32
    d0 = lt0.astype(f32)            # rating 1
    d1 = (gt0 & lt1).astype(f32)    # rating 2
    d2 = (gt1 & lt2).astype(f32)    # rating 3
    d3 = (gt2 & lt3).astype(f32)    # rating 4
    d4 = gt3.astype(f32)            # rating 5
    return d0, d1, d2, d3, d4


def _project_kernel(a_ref, mb_ref, ivl_ref, dist_ref, val_ref, *, epsilon):
    d0, d1, d2, d3, d4 = _bin_indicators(a_ref, mb_ref, ivl_ref, epsilon)
    od = dist_ref.dtype
    dist_ref[0] = d0.astype(od)
    dist_ref[1] = d1.astype(od)
    dist_ref[2] = d2.astype(od)
    dist_ref[3] = d3.astype(od)
    dist_ref[4] = d4.astype(od)
    val_ref[...] = (d0 + 2.0 * d1 + 3.0 * d2 + 4.0 * d3
                    + 5.0 * d4).astype(val_ref.dtype)


def _value_only_kernel(a_ref, mb_ref, ivl_ref, val_ref, *, epsilon):
    d0, d1, d2, d3, d4 = _bin_indicators(a_ref, mb_ref, ivl_ref, epsilon)
    val_ref[...] = (d0 + 2.0 * d1 + 3.0 * d2 + 4.0 * d3
                    + 5.0 * d4).astype(val_ref.dtype)


def _pick_tile(dim, target, align):
    """Largest multiple of `align` dividing `dim` and <= target; otherwise the
    full dim (always a legal single-block extent)."""
    if dim <= target:
        return dim
    t = (target // align) * align
    while t >= align:
        if dim % t == 0:
            return t
        t -= align
    return dim


def project_pallas(fake_tensor, min_boundary_value, interval_lengths, *,
                   epsilon=1e-4, dist_dtype=jnp.bfloat16,
                   value_dtype=jnp.float32, return_dist=True,
                   pytorch_layout=False, tb=None, tn=None):
    """Pallas implementation of BaseDiscretGenerator_1.project.

    fake_tensor:        (B, input_dim) continuous fake ratings
    min_boundary_value: (input_dim,)
    interval_lengths:   (input_dim, 3)

    Returns (dist, value). By default dist has the kernel-native lane-dense
    layout (5, B, input_dim) in bfloat16 (values are exactly 0/1 -> lossless).
    pytorch_layout=True returns the original (B, input_dim, 5) layout (costs
    an extra HBM pass). return_dist=False returns (None, value) and skips the
    5x-sized dist writeback entirely.
    """
    B, N = fake_tensor.shape
    a = fake_tensor.astype(jnp.float32)
    mb = jnp.asarray(min_boundary_value, jnp.float32).reshape(1, N)
    ivl_t = jnp.asarray(interval_lengths, jnp.float32).T        # (3, N), tiny

    if tb is None:
        # Prefer >=2 batch grid steps (feeds both v7x TensorCores) while
        # keeping the sublane dim 16-aligned (safe for the bf16 dist output).
        target_tb = 256
        if B <= target_tb and B % 32 == 0:
            target_tb = B // 2
        tb = _pick_tile(B, target_tb, 16)
    if tn is None:
        tn = _pick_tile(N, 512, 128)

    grid = (B // tb, N // tn)
    in_specs = [
        pl.BlockSpec((tb, tn), lambda i, j: (i, j)),
        pl.BlockSpec((1, tn), lambda i, j: (0, j)),
        pl.BlockSpec((3, tn), lambda i, j: (0, j)),
    ]
    # Footprint per grid step ~ (4 B input + 5*2 B dist + 4 B value) * tb*tn,
    # double-buffered ~= 36 B/elem -> < 5 MiB at the 256x512 target tile:
    # comfortably inside v5e's 16 MiB / v6e-v7x's 32 MiB scoped VMEM.
    compiler_params = pltpu.CompilerParams(
        dimension_semantics=("parallel", "parallel"),
        vmem_limit_bytes=32 * 1024 * 1024,
    )

    if not return_dist:
        value = pl.pallas_call(
            functools.partial(_value_only_kernel, epsilon=float(epsilon)),
            out_shape=jax.ShapeDtypeStruct((B, N), value_dtype),
            grid_spec=pltpu.PrefetchScalarGridSpec(
                num_scalar_prefetch=0, grid=grid,
                in_specs=in_specs,
                out_specs=pl.BlockSpec((tb, tn), lambda i, j: (i, j)),
            ),
            compiler_params=compiler_params,
        )(a, mb, ivl_t)
        return None, value

    dist_5bn, value = pl.pallas_call(
        functools.partial(_project_kernel, epsilon=float(epsilon)),
        out_shape=(
            jax.ShapeDtypeStruct((5, B, N), dist_dtype),
            jax.ShapeDtypeStruct((B, N), value_dtype),
        ),
        grid_spec=pltpu.PrefetchScalarGridSpec(
            num_scalar_prefetch=0, grid=grid,
            in_specs=in_specs,
            out_specs=[
                pl.BlockSpec((5, tb, tn), lambda i, j: (0, i, j)),
                pl.BlockSpec((tb, tn), lambda i, j: (i, j)),
            ],
        ),
        compiler_params=compiler_params,
    )(a, mb, ivl_t)

    if pytorch_layout:
        # Exact PyTorch return layout (B, N, 5): one extra HBM read+write of
        # the largest array; prefer the kernel-native layout when possible.
        return jnp.transpose(dist_5bn, (1, 2, 0)), value
    return dist_5bn, value


def _reference(fake, min_bv, ivl, epsilon=1e-4):
    """Pure-numpy reference mirroring the PyTorch code (same f32 assoc.)."""
    fake = np.asarray(fake, np.float32)
    N = fake.shape[1]
    lens = (np.maximum(np.asarray(ivl, np.float32), 0.0)
            + np.float32(epsilon))                       # relu + eps
    bnd = np.zeros((N, 4), np.float32)
    bnd[:, 0] = np.asarray(min_bv, np.float32)
    for i in range(1, 4):
        bnd[:, i] = bnd[:, i - 1] + lens[:, i - 1]
    dist = np.zeros(fake.shape + (5,), np.float32)
    for r in range(5):
        prob = np.ones_like(fake)
        for k in range(4):
            sgn = np.sign(r - k - 0.5).astype(np.float32)
            x = sgn * (fake - bnd[None, :, k])
            prob = prob * np.where(x <= 0.0, 0.0, 1.0).astype(np.float32)
        dist[..., r] = prob
    value = dist @ np.arange(1.0, 6.0, dtype=np.float32)
    return dist, value


if __name__ == "__main__":
    B, input_dim = 8, 32

    # Deterministic parameter init, matching the module's __init__ (all ones).
    min_boundary_value = jnp.ones((input_dim,), jnp.float32)
    interval_lengths = jnp.ones((input_dim, 3), jnp.float32)

    # Deterministic example input: continuous "fake ratings" in [0, 6).
    key = jax.random.PRNGKey(0)
    fake_tensor = jax.random.uniform(
        key, (B, input_dim), dtype=jnp.float32, minval=0.0, maxval=6.0)
    # Force one exact-tie point (a == boundary 0) to exercise the reference's
    # all-zero-distribution / value-0 tie behaviour.
    fake_tensor = fake_tensor.at[0, 0].set(1.0)

    ref_dist, ref_value = _reference(np.asarray(fake_tensor),
                                     np.asarray(min_boundary_value),
                                     np.asarray(interval_lengths))

    # Default fast path: kernel-native (5, B, N) bf16 dist + f32 value.
    dist, value = project_pallas(fake_tensor, min_boundary_value,
                                 interval_lengths)
    jax.block_until_ready((dist, value))
    np.testing.assert_allclose(
        np.transpose(np.asarray(dist).astype(np.float32), (1, 2, 0)),
        ref_dist, atol=0.0)
    np.testing.assert_allclose(np.asarray(value), ref_value, atol=0.0)

    # Compatibility path: exact PyTorch layout/dtype.
    dist_pt, value_pt = project_pallas(
        fake_tensor, min_boundary_value, interval_lengths,
        dist_dtype=jnp.float32, pytorch_layout=True)
    jax.block_until_ready((dist_pt, value_pt))
    np.testing.assert_allclose(np.asarray(dist_pt), ref_dist, atol=0.0)
    np.testing.assert_allclose(np.asarray(value_pt), ref_value, atol=0.0)

    # Value-only mode (no dist writeback at all).
    _, value_only = project_pallas(fake_tensor, min_boundary_value,
                                   interval_lengths, return_dist=False)
    jax.block_until_ready(value_only)
    np.testing.assert_allclose(np.asarray(value_only), ref_value, atol=0.0)

    print("KERNEL_OK")
</pallas_src>

<mosaic_0001>
module attributes {stable_mosaic.version = 11 : i64} {
  func.func @_project_kernel(%arg0: i32, %arg1: i32, %arg2: memref<8x32xf32, #tpu.memory_space<vmem>>, %arg3: memref<1x32xf32, #tpu.memory_space<vmem>>, %arg4: memref<3x32xf32, #tpu.memory_space<vmem>>, %arg5: memref<5x8x32xbf16, #tpu.memory_space<vmem>>, %arg6: memref<8x32xf32, #tpu.memory_space<vmem>>) attributes {dimension_semantics = [#tpu.dimension_semantics<parallel>, #tpu.dimension_semantics<parallel>], iteration_bounds = array<i64: 1, 1>, scalar_prefetch = 0 : i64, scratch_operands = 0 : i64, tpu.core_type = #tpu.core_type<tc>, window_params = [{transform_indices = @transform_0, window_bounds = array<i64: 8, 32>}, {transform_indices = @transform_1, window_bounds = array<i64: 1, 32>}, {transform_indices = @transform_2, window_bounds = array<i64: 3, 32>}, {transform_indices = @transform_3, window_bounds = array<i64: 5, 8, 32>}, {transform_indices = @transform_4, window_bounds = array<i64: 8, 32>}]} {
    %c0 = arith.constant 0 : index
    %c0_0 = arith.constant 0 : index
    %0 = vector.load %arg2[%c0, %c0_0] : memref<8x32xf32, #tpu.memory_space<vmem>>, vector<8x32xf32>
    %c0_1 = arith.constant 0 : index
    %c0_2 = arith.constant 0 : index
    %1 = vector.load %arg4[%c0_1, %c0_2] : memref<3x32xf32, #tpu.memory_space<vmem>>, vector<3x32xf32>
    %cst = arith.constant 0.000000e+00 : f32
    %2 = vector.broadcast %cst : f32 to vector<3x32xf32>
    %3 = arith.maximumf %1, %2 : vector<3x32xf32>
    %cst_3 = arith.constant 9.99999974E-5 : f32
    %4 = vector.broadcast %cst_3 : f32 to vector<3x32xf32>
    %5 = arith.addf %3, %4 : vector<3x32xf32>
    %c0_4 = arith.constant 0 : index
    %c0_5 = arith.constant 0 : index
    %6 = vector.load %arg3[%c0_4, %c0_5] : memref<1x32xf32, #tpu.memory_space<vmem>>, vector<1x32xf32>
    %7 = vector.extract_strided_slice %5 {offsets = [0, 0], sizes = [1, 32], strides = [1, 1]} : vector<3x32xf32> to vector<1x32xf32>
    %8 = arith.addf %6, %7 : vector<1x32xf32>
    %9 = vector.extract_strided_slice %5 {offsets = [1, 0], sizes = [1, 32], strides = [1, 1]} : vector<3x32xf32> to vector<1x32xf32>
    %10 = arith.addf %8, %9 : vector<1x32xf32>
    %11 = vector.extract_strided_slice %5 {offsets = [2, 0], sizes = [1, 32], strides = [1, 1]} : vector<3x32xf32> to vector<1x32xf32>
    %12 = arith.addf %10, %11 : vector<1x32xf32>
    %13 = vector.broadcast %6 : vector<1x32xf32> to vector<8x32xf32>
    %14 = arith.cmpf ogt, %0, %13 : vector<8x32xf32>
    %15 = vector.broadcast %8 : vector<1x32xf32> to vector<8x32xf32>
    %16 = arith.cmpf ogt, %0, %15 : vector<8x32xf32>
    %17 = vector.broadcast %10 : vector<1x32xf32> to vector<8x32xf32>
    %18 = arith.cmpf ogt, %0, %17 : vector<8x32xf32>
    %19 = vector.broadcast %12 : vector<1x32xf32> to vector<8x32xf32>
    %20 = arith.cmpf ogt, %0, %19 : vector<8x32xf32>
    %21 = vector.broadcast %6 : vector<1x32xf32> to vector<8x32xf32>
    %22 = arith.cmpf olt, %0, %21 : vector<8x32xf32>
    %23 = vector.broadcast %8 : vector<1x32xf32> to vector<8x32xf32>
    %24 = arith.cmpf olt, %0, %23 : vector<8x32xf32>
    %25 = vector.broadcast %10 : vector<1x32xf32> to vector<8x32xf32>
    %26 = arith.cmpf olt, %0, %25 : vector<8x32xf32>
    %27 = vector.broadcast %12 : vector<1x32xf32> to vector<8x32xf32>
    %28 = arith.cmpf olt, %0, %27 : vector<8x32xf32>
    %29 = arith.extui %22 : vector<8x32xi1> to vector<8x32xi32>
    %30 = arith.sitofp %29 : vector<8x32xi32> to vector<8x32xf32>
    %31 = arith.andi %14, %24 : vector<8x32xi1>
    %32 = arith.extui %31 : vector<8x32xi1> to vector<8x32xi32>
    %33 = arith.sitofp %32 : vector<8x32xi32> to vector<8x32xf32>
    %34 = arith.andi %16, %26 : vector<8x32xi1>
    %35 = arith.extui %34 : vector<8x32xi1> to vector<8x32xi32>
    %36 = arith.sitofp %35 : vector<8x32xi32> to vector<8x32xf32>
    %37 = arith.andi %18, %28 : vector<8x32xi1>
    %38 = arith.extui %37 : vector<8x32xi1> to vector<8x32xi32>
    %39 = arith.sitofp %38 : vector<8x32xi32> to vector<8x32xf32>
    %40 = arith.extui %20 : vector<8x32xi1> to vector<8x32xi32>
    %41 = arith.sitofp %40 : vector<8x32xi32> to vector<8x32xf32>
    %42 = arith.truncf %30 : vector<8x32xf32> to vector<8x32xbf16>
    %c0_6 = arith.constant 0 : index
    %c0_7 = arith.constant 0 : index
    %c0_8 = arith.constant 0 : index
    %43 = vector.load %arg5[%c0_6, %c0_7, %c0_8] : memref<5x8x32xbf16, #tpu.memory_space<vmem>>, vector<1x8x32xbf16>
    %44 = vector.shape_cast %43 : vector<1x8x32xbf16> to vector<8x32xbf16>
    %45 = vector.shape_cast %42 : vector<8x32xbf16> to vector<1x8x32xbf16>
    tpu.vector_store %arg5[%c0_6, %c0_7, %c0_8], %45 {strides = array<i32>} : memref<5x8x32xbf16, #tpu.memory_space<vmem>>, vector<1x8x32xbf16>,
    %46 = arith.truncf %33 : vector<8x32xf32> to vector<8x32xbf16>
    %c1 = arith.constant 1 : index
    %c0_9 = arith.constant 0 : index
    %c0_10 = arith.constant 0 : index
    %47 = vector.load %arg5[%c1, %c0_9, %c0_10] : memref<5x8x32xbf16, #tpu.memory_space<vmem>>, vector<1x8x32xbf16>
    %48 = vector.shape_cast %47 : vector<1x8x32xbf16> to vector<8x32xbf16>
    %49 = vector.shape_cast %46 : vector<8x32xbf16> to vector<1x8x32xbf16>
    tpu.vector_store %arg5[%c1, %c0_9, %c0_10], %49 {strides = array<i32>} : memref<5x8x32xbf16, #tpu.memory_space<vmem>>, vector<1x8x32xbf16>,
    %50 = arith.truncf %36 : vector<8x32xf32> to vector<8x32xbf16>
    %c2 = arith.constant 2 : index
    %c0_11 = arith.constant 0 : index
    %c0_12 = arith.constant 0 : index
    %51 = vector.load %arg5[%c2, %c0_11, %c0_12] : memref<5x8x32xbf16, #tpu.memory_space<vmem>>, vector<1x8x32xbf16>
    %52 = vector.shape_cast %51 : vector<1x8x32xbf16> to vector<8x32xbf16>
    %53 = vector.shape_cast %50 : vector<8x32xbf16> to vector<1x8x32xbf16>
    tpu.vector_store %arg5[%c2, %c0_11, %c0_12], %53 {strides = array<i32>} : memref<5x8x32xbf16, #tpu.memory_space<vmem>>, vector<1x8x32xbf16>,
    %54 = arith.truncf %39 : vector<8x32xf32> to vector<8x32xbf16>
    %c3 = arith.constant 3 : index
    %c0_13 = arith.constant 0 : index
    %c0_14 = arith.constant 0 : index
    %55 = vector.load %arg5[%c3, %c0_13, %c0_14] : memref<5x8x32xbf16, #tpu.memory_space<vmem>>, vector<1x8x32xbf16>
    %56 = vector.shape_cast %55 : vector<1x8x32xbf16> to vector<8x32xbf16>
    %57 = vector.shape_cast %54 : vector<8x32xbf16> to vector<1x8x32xbf16>
    tpu.vector_store %arg5[%c3, %c0_13, %c0_14], %57 {strides = array<i32>} : memref<5x8x32xbf16, #tpu.memory_space<vmem>>, vector<1x8x32xbf16>,
    %58 = arith.truncf %41 : vector<8x32xf32> to vector<8x32xbf16>
    %c4 = arith.constant 4 : index
    %c0_15 = arith.constant 0 : index
    %c0_16 = arith.constant 0 : index
    %59 = vector.load %arg5[%c4, %c0_15, %c0_16] : memref<5x8x32xbf16, #tpu.memory_space<vmem>>, vector<1x8x32xbf16>
    %60 = vector.shape_cast %59 : vector<1x8x32xbf16> to vector<8x32xbf16>
    %61 = vector.shape_cast %58 : vector<8x32xbf16> to vector<1x8x32xbf16>
    tpu.vector_store %arg5[%c4, %c0_15, %c0_16], %61 {strides = array<i32>} : memref<5x8x32xbf16, #tpu.memory_space<vmem>>, vector<1x8x32xbf16>,
    %cst_17 = arith.constant 2.000000e+00 : f32
    %62 = vector.broadcast %cst_17 : f32 to vector<8x32xf32>
    %63 = arith.mulf %62, %33 : vector<8x32xf32>
    %64 = arith.addf %30, %63 : vector<8x32xf32>
    %cst_18 = arith.constant 3.000000e+00 : f32
    %65 = vector.broadcast %cst_18 : f32 to vector<8x32xf32>
    %66 = arith.mulf %65, %36 : vector<8x32xf32>
    %67 = arith.addf %64, %66 : vector<8x32xf32>
    %cst_19 = arith.constant 4.000000e+00 : f32
    %68 = vector.broadcast %cst_19 : f32 to vector<8x32xf32>
    %69 = arith.mulf %68, %39 : vector<8x32xf32>
    %70 = arith.addf %67, %69 : vector<8x32xf32>
    %cst_20 = arith.constant 5.000000e+00 : f32
    %71 = vector.broadcast %cst_20 : f32 to vector<8x32xf32>
    %72 = arith.mulf %71, %41 : vector<8x32xf32>
    %73 = arith.addf %70, %72 : vector<8x32xf32>
    %c0_21 = arith.constant 0 : index
    %c0_22 = arith.constant 0 : index
    %74 = vector.load %arg6[%c0_21, %c0_22] : memref<8x32xf32, #tpu.memory_space<vmem>>, vector<8x32xf32>
    tpu.vector_store %arg6[%c0_21, %c0_22], %73 {strides = array<i32>} : memref<8x32xf32, #tpu.memory_space<vmem>>, vector<8x32xf32>,
    return
  }
  func.func @transform_0(%arg0: i32, %arg1: i32) -> (i32, i32) {
    %c0_i32 = arith.constant 0 : i32
    return %arg0, %arg1 : i32, i32
  }
  func.func @transform_1(%arg0: i32, %arg1: i32) -> (i32, i32) {
    %c0_i32 = arith.constant 0 : i32
    %c0_i32_0 = arith.constant 0 : i32
    return %c0_i32, %arg1 : i32, i32
  }
  func.func @transform_2(%arg0: i32, %arg1: i32) -> (i32, i32) {
    %c0_i32 = arith.constant 0 : i32
    %c0_i32_0 = arith.constant 0 : i32
    return %c0_i32, %arg1 : i32, i32
  }
  func.func @transform_3(%arg0: i32, %arg1: i32) -> (i32, i32, i32) {
    %c0_i32 = arith.constant 0 : i32
    %c0_i32_0 = arith.constant 0 : i32
    return %c0_i32, %arg0, %arg1 : i32, i32, i32
  }
  func.func @transform_4(%arg0: i32, %arg1: i32) -> (i32, i32) {
    %c0_i32 = arith.constant 0 : i32
    return %arg0, %arg1 : i32, i32
  }
}

</mosaic_0001>

<bundles_post_ra>
// kernel: tpu_custom_call.1
= control target key start
LH: loop header
LB: loop body
LE: loop exit
PB: predicated region body
PF: predicated region fallthrough
CT: control target
= control target key end

     0   :  { %10 = vsyncpa [#allocation3], 0  ;;  %s329_s0 = inlined_call_operand.hbm [shape: f32[8,32], index: 0, kind: input, shape index: {}]   ;;  %s330_s1 = inlined_call_operand.vmem [shape: f32[1,32], index: 1, kind: input, shape index: {}]   ;;  %s331_s2 = inlined_call_operand.vmem [shape: f32[3,32], index: 2, kind: input, shape index: {}]   ;;  %s332_s3 = inlined_call_operand.hbm [shape: bf16[5,8,32], index: 3, kind: output, shape index: {0}]   ;;  %s333_s4 = inlined_call_operand.hbm [shape: f32[8,32], index: 4, kind: output, shape index: {1}]  }
   0x1   :  { %11 = vsyncpa [#allocation4], 0 }
   0x2   :  { %12 = vsyncpa [#allocation7], 0  ;;  %s249_s15 = smov [#allocation2]   ;;  %s177_s19 = scalar_lea.hbm %s329_s0, 128 }
   0x3   :  { %s19_s16 = sshll.u32 %s249_s15, 4  ;;  %p178_p0 = scmp.ne.s32.totalorder %s329_s0, %s177_s19  ;;  %s20_s16 = int_to_ptr.vmem [resolvable:$true] %s19_s16 }
   0x4   :  { %p181_p1 = scmp.lt.u32.totalorder %s177_s19, %s329_s0 }
   0x6   :  { %p183_p2 = pnand %p181_p1, %p178_p0 }
   0x8   :  { %186 = shalt.err (!%p183_p2)
}
   0x9   :  { %s187_s24 = scalar_lea.vmem %s20_s16, 128  ;;  %p192_p4 = scmp.lt.s32.totalorder %s20_s16, %s20_s16 }
   0xa   :  { %p188_p3 = scmp.ne.s32.totalorder %s20_s16, %s187_s24  ;;  %p193_p5 = scmp.lt.s32.totalorder %s187_s24, %s187_s24 }
   0xc   :  { %p194_p6 = por %p193_p5, %p192_p4 }
   0xe   :  { %p195_p7 = pnand %p194_p6, %p188_p3 }
  0x10   :  { %198 = shalt.err (!%p195_p7)
}
  0x11   :  { %22 = dma.hbm_to_vmem [thread:$0]  %s329_s0, 128, %s20_s16, [#allocation3]  }
  0x12   :  { %243 = dma.done.wait [#allocation3], 128  }
  0x13   :  { %244 = vsyncadd [#allocation3], 4294967168  ;;  %v40_v0 = vlaneseq  ;;  %v250_v1 = vmov 1966171168   ;;  %v31_v6 = vld [vmem:[%s331_s2] sm:$0x7] }
  0x14   :  { %v38_v2 = vunpack.c.l.s4 %v250_v1  ;;  %v34_v7 = vld [vmem:[%s330_s1] sm:$0x1]  ;;  %v32_v8 = vmax.f32 %v31_v6, 0.0  ;;  %v251_v13 = vmov 0.0   ;;  %vm110_vm1 = vcmask 257024   ;;  %s252_s0 = smov [#allocation5]  }
  0x15   :  { %v41_v3 = vshrl.u32 %v40_v0, 7  ;;  %v30_v11 = vld [vmem:[#allocation2] sm:$0xff]  ;;  %s139_s1 = sshll.u32 %s252_s0, 4  ;;  %s253_s2 = smov [#allocation6]   ;;  %vm132_vm12 = vcmask 261120   ;;  %s140_s1 = int_to_ptr.vmem [resolvable:$true] %s139_s1 }
  0x16   :  { %v39_v4 = vunpack.c.0.s8 %v38_v2  ;;  %v33_v12 = vadd.f32 0.0001, %v32_v8  ;;  %s152_s5 = sshll.u32 %s253_s2, 4  ;;  %s199_s6 = scalar_lea.vmem %s140_s1, 320  ;;  %s153_s5 = int_to_ptr.vmem [resolvable:$true] %s152_s5 }
  0x17   :  { %v67_v5 = vsub.s32 0, %v41_v3  ;;  %p200_p8 = scmp.ne.s32.totalorder %s140_s1, %s199_s6  ;;  %p204_p9 = scmp.lt.s32.totalorder %s140_s1, %s140_s1 }
  0x18   :  { %v42_v9 = vsub.s32 %v39_v4, %v41_v3  ;;  %v35_v15 = vadd.f32 %v34_v7, %v33_v12  ;;  %p205_p10 = scmp.lt.s32.totalorder %s199_s6, %s199_s6 }
  0x19   :  { %v68_v10 = vrot.slane %v34_v7, %v67_v5 }
  0x1a   :  { %v43_v16 = vrot.slane %v33_v12, %v42_v9  ;;  %v75_v18 = vrot.slane %v35_v15, %v67_v5  ;;  %p206_p11 = por %p205_p10, %p204_p9 }
  0x1b   :  { %vm92_vm0 = vcmp.lt.f32.partialorder %v30_v11, %v68_v10  ;;  %vm70_vm2 = vcmp.gt.f32.partialorder %v30_v11, %v68_v10 }
  0x1c   :  { %v165_v14 = vsel %vm92_vm0, 1.0, %v251_v13  ;;  %v44_v19 = vcombine.high %v43_v16, %v43_v16  ;;  %v51_v20 = vrot.slane %v43_v16, %v42_v9  ;;  %vm93_vm3 = vcmp.lt.f32.partialorder %v30_v11, %v75_v18  ;;  %p207_p12 = pnand %p206_p11, %p200_p8 }
  0x1d   :  { %v109_v17 = vpack.c.bf16 %v165_v14, %v165_v14  ;;  %vm98_vm4 = vmand %vm70_vm2, %vm93_vm3  ;;  %vm77_vm5 = vcmp.gt.f32.partialorder %v30_v11, %v75_v18 }
  0x1e   :  { %v58_v21 = vrot.slane %v44_v19, %v42_v9  ;;  %v61_v22 = vcombine.high %v51_v20, %v51_v20  ;;  %v166_v23 = vsel %vm98_vm4, 1.0, %v251_v13 }
  0x1f   :  { %111 = vst.msk [vmem:[#allocation5] sm:$0xf] %vm110_vm1, %v109_v17  ;;  %v112_v25 = vpack.c.bf16 %v166_v23, %v166_v23  ;;  %v124_v26 = vmul.f32 2.0, %v166_v23 }
  0x20   :  { %v60_v24 = vadd.f32 %v58_v21, %v35_v15 }
  0x21   :  { %114 = vst.msk [vmem:[#allocation5 + $0x4] sm:$0xf] %vm110_vm1, %v112_v25  ;;  %v125_v30 = vadd.f32 %v165_v14, %v124_v26 }
  0x22   :  { %v82_v27 = vrot.slane %v60_v24, %v67_v5  ;;  %v63_v28 = vadd.f32 %v61_v22, %v60_v24 }
  0x24   :  { %vm94_vm6 = vcmp.lt.f32.partialorder %v30_v11, %v82_v27  ;;  %vm84_vm7 = vcmp.gt.f32.partialorder %v30_v11, %v82_v27  ;;  %v89_v29 = vrot.slane %v63_v28, %v67_v5 }
  0x25   :  { %vm101_vm8 = vmand %vm77_vm5, %vm94_vm6 }
  0x26   :  { %v167_v31 = vsel %vm101_vm8, 1.0, %v251_v13  ;;  %vm95_vm9 = vcmp.lt.f32.partialorder %v30_v11, %v89_v29  ;;  %vm91_vm10 = vcmp.gt.f32.partialorder %v30_v11, %v89_v29 }
  0x27   :  { %v115_v32 = vpack.c.bf16 %v167_v31, %v167_v31  ;;  %v126_v33 = vmul.f32 3.0, %v167_v31  ;;  %vm104_vm11 = vmand %vm84_vm7, %vm95_vm9  ;;  %v169_v34 = vsel %vm91_vm10, 1.0, %v251_v13 }
  0x28   :  { %v168_v35 = vsel %vm104_vm11, 1.0, %v251_v13  ;;  %v121_v36 = vpack.c.bf16 %v169_v34, %v169_v34  ;;  %v130_v40 = vmul.f32 5.0, %v169_v34 }
  0x29   :  { %117 = vst.msk [vmem:[#allocation5 + $0x8] sm:$0xf] %vm110_vm1, %v115_v32  ;;  %v118_v37 = vpack.c.bf16 %v168_v35, %v168_v35  ;;  %v128_v38 = vmul.f32 4.0, %v168_v35  ;;  %v127_v39 = vadd.f32 %v126_v33, %v125_v30 }
  0x2a   :  { %123 = vst.msk [vmem:[#allocation5 + $0x10] sm:$0xf] %vm110_vm1, %v121_v36 }
  0x2b   :  { %120 = vst.msk [vmem:[#allocation5 + $0xc] sm:$0xf] %vm110_vm1, %v118_v37  ;;  %v129_v41 = vadd.f32 %v128_v38, %v127_v39 }
  0x2c   :  { %210 = shalt.err (!%p207_p12)
}
  0x2d   :  { %s211_s9 = scalar_lea.hbm %s332_s3, 320 }
  0x2e   :  { %p212_p13 = scmp.ne.s32.totalorder %s332_s3, %s211_s9  ;;  %p215_p0 = scmp.lt.u32.totalorder %s211_s9, %s332_s3 }
  0x30   :  { %p217_p1 = pnand %p215_p0, %p212_p13 }
  0x32   :  { %220 = shalt.err (!%p217_p1)
}
  0x33   :  { %s254_s14 = smov 64   ;;  %s255_s15 = smov 4   ;;  %v131_v42 = vadd.f32 %v130_v40, %v129_v41 }
  0x34   :  { %145 = dma.vmem_to_hbm [thread:$0]  %s140_s1, 320, %s332_s3, [#allocation4], %s254_s14, %s254_s14, %s255_s15  }
  0x35   :  { %133 = vst.msk [vmem:[#allocation6] sm:$0xff] %vm132_vm12, %v131_v42  ;;  %s221_s18 = scalar_lea.vmem %s153_s5, 128  ;;  %p226_p3 = scmp.lt.s32.totalorder %s153_s5, %s153_s5 }
  0x36   :  { %p222_p2 = scmp.ne.s32.totalorder %s153_s5, %s221_s18  ;;  %p227_p4 = scmp.lt.s32.totalorder %s221_s18, %s221_s18 }
  0x38   :  { %p228_p5 = por %p227_p4, %p226_p3 }
  0x3a   :  { %p229_p6 = pnand %p228_p5, %p222_p2 }
  0x3c   :  { %232 = shalt.err (!%p229_p6)
}
  0x3d   :  { %s233_s21 = scalar_lea.hbm %s333_s4, 128 }
  0x3e   :  { %p234_p7 = scmp.ne.s32.totalorder %s333_s4, %s233_s21  ;;  %p237_p8 = scmp.lt.u32.totalorder %s233_s21, %s333_s4 }
  0x40   :  { %p239_p9 = pnand %p237_p8, %p234_p7 }
  0x42   :  { %242 = shalt.err (!%p239_p9)
}
  0x43   :  { %155 = dma.vmem_to_hbm [thread:$0]  %s153_s5, 128, %s333_s4, [#allocation7]  }
  0x44   :  { %245 = dma.done.wait [#allocation4], 320  }
  0x45   :  { %246 = vsyncadd [#allocation4], 4294966976 }
  0x46   :  { %247 = dma.done.wait [#allocation7], 128  }
  0x47   :  { %248 = vsyncadd [#allocation7], 4294967168 }
  0x48   :  { %162 = vsyncpa [#allocation3], 1 }
  0x49   :  { %163 = vsyncpa [#allocation4], 1 }
  0x4a   :  { %164 = vsyncpa [#allocation7], 1 }

</bundles_post_ra>
